<compile_context>
chip_gen: v5e
topology: v5e:2x2
jax: 0.10.0
libtpu: 0.0.40
codegen_flags: <defaults>
</compile_context>

<pallas_src>
import functools
import math

import jax
import jax.numpy as jnp
from jax.experimental import pallas as pl
from jax.experimental.pallas import tpu as pltpu


_VMEM_LIMIT = 32 * 1024 * 1024  # explicit scoped-VMEM budget (fits v5e/v6e/v7x)


# ----------------------------------------------------------------------------
# Helpers
# ----------------------------------------------------------------------------
def _round_up(x, m):
    return ((x + m - 1) // m) * m


def _pad2(a, rows, cols):
    return jnp.pad(a, ((0, rows - a.shape[0]), (0, cols - a.shape[1])))


def _pick_tiles(n, tm_target=512, tk_target=512):
    """Pick (tm, tk) tile sizes: big (512-class) tiles, divisors of n,
    and at least 2 row tiles when possible (megacore / v7x dual-TC)."""
    def pick(target, min_tiles):
        for cand in (1024, 512, 256, 128):
            if cand <= target and n % cand == 0 and n // cand >= min_tiles:
                return cand
        return n  # single full-extent tile (always legal)
    tk = pick(tk_target, 1)
    tm = pick(tm_target, 2)
    return tm, tk


# ----------------------------------------------------------------------------
# Kernels
# ----------------------------------------------------------------------------
def _gcn_first_kernel(adj_ref, xw_ref, b0_ref, x0_ref, z_ref, acc_ref):
    """Layer 0: z0 = A_hat @ (x @ W0) + b0, with x@W0 hoisted to the wrapper.

    Emits the residual x0 in f32 and the layer-1 input stream z in bf16."""
    k = pl.program_id(1)

    @pl.when(k == 0)
    def _():
        acc_ref[...] = jnp.zeros_like(acc_ref)

    acc_ref[...] += jnp.dot(adj_ref[...], xw_ref[...],
                            preferred_element_type=jnp.float32)

    @pl.when(k == pl.num_programs(1) - 1)
    def _():
        z0 = acc_ref[...] + b0_ref[...]
        x0_ref[...] = z0
        z_ref[...] = z0.astype(jnp.bfloat16)


def _gcn2_kernel(adj_ref, z_ref, x0_ref, w_ref, scale_ref, shift_ref,
                 zout_ref, stats_ref, acc_ref,
                 *, alpha, beta_l, norm_input, activation):
    """One GCN2Conv layer on a row tile.

    If norm_input, the previous layer's fused BatchNorm + activation is applied
    to the bf16 z k-panel right after load (scale/shift already fold mean, var,
    gamma, beta).  Also emits per-row-tile partial BN stats for the next layer."""
    k = pl.program_id(1)

    @pl.when(k == 0)
    def _():
        acc_ref[...] = jnp.zeros_like(acc_ref)

    zin = z_ref[...]                                      # bf16 (tk, hp)
    if norm_input:
        y = zin.astype(jnp.float32) * scale_ref[...] + shift_ref[...]
        if activation == "relu":
            y = jnp.maximum(y, 0.0)
        elif activation == "leaky_relu":
            y = jnp.where(y > 0.0, y, 0.01 * y)
        elif activation == "tanh":
            y = jnp.tanh(y)
        zin = y.astype(jnp.bfloat16)

    acc_ref[...] += jnp.dot(adj_ref[...], zin,
                            preferred_element_type=jnp.float32)

    @pl.when(k == pl.num_programs(1) - 1)
    def _():
        h = acc_ref[...]
        out = (1.0 - alpha) * h + alpha * x0_ref[...]
        # bf16 MXU matmul with f32 accumulation; residual mixing stays f32.
        z_new = (1.0 - beta_l) * out + beta_l * jnp.dot(
            out.astype(jnp.bfloat16), w_ref[...],
            preferred_element_type=jnp.float32)
        zout_ref[...] = z_new.astype(jnp.bfloat16)
        # Partial BatchNorm stats for this row tile (two direct slice stores).
        s1 = jnp.sum(z_new, axis=0, keepdims=True)         # (1, Hp)
        s2 = jnp.sum(z_new * z_new, axis=0, keepdims=True)  # (1, Hp)
        stats_ref[:, 0:1, :] = s1[None]
        stats_ref[:, 1:2, :] = s2[None]


# ----------------------------------------------------------------------------
# pallas_call wrappers
# ----------------------------------------------------------------------------
def _gcn_first_layer(adj_bf, xw_bf, b0_p, *, tm, tk):
    n = adj_bf.shape[0]
    hp = xw_bf.shape[1]
    r, kt = n // tm, n // tk
    cost = pl.CostEstimate(
        flops=int(2 * n * n * hp + 2 * n * hp),
        transcendentals=0,
        bytes_accessed=int(n * n * 2 + r * n * hp * 2 + hp * 4
                           + n * hp * 4 + n * hp * 2),
    )
    return pl.pallas_call(
        _gcn_first_kernel,
        out_shape=(
            jax.ShapeDtypeStruct((n, hp), jnp.float32),     # x0 (residual, f32)
            jax.ShapeDtypeStruct((n, hp), jnp.bfloat16),    # z  (bf16 stream)
        ),
        grid_spec=pltpu.PrefetchScalarGridSpec(
            num_scalar_prefetch=0,
            grid=(r, kt),
            in_specs=[
                pl.BlockSpec((tm, tk), lambda i, k: (i, k)),   # A_hat tile
                pl.BlockSpec((tk, hp), lambda i, k: (k, 0)),   # xw k-panel
                pl.BlockSpec((1, hp), lambda i, k: (0, 0)),    # b0 (resident)
            ],
            out_specs=(
                pl.BlockSpec((tm, hp), lambda i, k: (i, 0)),
                pl.BlockSpec((tm, hp), lambda i, k: (i, 0)),
            ),
            scratch_shapes=[pltpu.VMEM((tm, hp), jnp.float32)],
        ),
        compiler_params=pltpu.CompilerParams(
            dimension_semantics=("parallel", "arbitrary"),
            vmem_limit_bytes=_VMEM_LIMIT,
        ),
        cost_estimate=cost,
    )(adj_bf, xw_bf, b0_p)


def _gcn2_layer(adj_bf, z_bf, x0, w_bf, scale, shift, *, alpha, beta_l,
                norm_input, activation, tm, tk):
    n = adj_bf.shape[0]
    hp = z_bf.shape[1]
    r, kt = n // tm, n // tk
    cost = pl.CostEstimate(
        flops=int(2 * n * n * hp + 2 * n * hp * hp + 8 * n * hp
                  + (4 * r * n * hp if norm_input else 0)),
        transcendentals=0,
        bytes_accessed=int(n * n * 2 + r * n * hp * 2 + n * hp * 4
                           + hp * hp * 2 + 2 * hp * 4
                           + n * hp * 2 + r * 2 * hp * 4),
    )
    kernel = functools.partial(_gcn2_kernel, alpha=alpha, beta_l=beta_l,
                               norm_input=norm_input, activation=activation)
    return pl.pallas_call(
        kernel,
        out_shape=(
            jax.ShapeDtypeStruct((n, hp), jnp.bfloat16),      # z_new (bf16 stream)
            jax.ShapeDtypeStruct((r, 2, hp), jnp.float32),    # per-tile (sum, sum_sq)
        ),
        grid_spec=pltpu.PrefetchScalarGridSpec(
            num_scalar_prefetch=0,
            grid=(r, kt),
            in_specs=[
                pl.BlockSpec((tm, tk), lambda i, k: (i, k)),   # A_hat tile
                pl.BlockSpec((tk, hp), lambda i, k: (k, 0)),   # z k-panel (bf16)
                pl.BlockSpec((tm, hp), lambda i, k: (i, 0)),   # x0 rows (per i)
                pl.BlockSpec((hp, hp), lambda i, k: (0, 0)),   # W_l (resident, bf16)
                pl.BlockSpec((1, hp), lambda i, k: (0, 0)),    # BN scale (resident)
                pl.BlockSpec((1, hp), lambda i, k: (0, 0)),    # BN shift (resident)
            ],
            out_specs=(
                pl.BlockSpec((tm, hp), lambda i, k: (i, 0)),
                pl.BlockSpec((1, 2, hp), lambda i, k: (i, 0, 0)),
            ),
            scratch_shapes=[pltpu.VMEM((tm, hp), jnp.float32)],
        ),
        compiler_params=pltpu.CompilerParams(
            dimension_semantics=("parallel", "arbitrary"),
            vmem_limit_bytes=_VMEM_LIMIT,
        ),
        cost_estimate=cost,
    )(adj_bf, z_bf, x0, w_bf, scale, shift)


# ----------------------------------------------------------------------------
# Full GCNII forward
# ----------------------------------------------------------------------------
def gcnii_forward(x, adj, w0, b0, w_stack, bn_gamma, bn_beta,
                  *, alpha, theta, activation, tm=None, tk=None, eps=1e-5):
    n, _ = x.shape
    h = w0.shape[1]
    num_layers = w_stack.shape[0]

    tm_auto, tk_auto = _pick_tiles(n)
    tm = tm_auto if tm is None else min(tm, n)
    tk = tk_auto if tk is None else min(tk, n)
    assert n % tm == 0 and n % tk == 0, "num_nodes must be divisible by tile sizes"

    hp = max(_round_up(h, 128), 128)      # lane-dense hidden dim

    # Pad / cast once in the wrapper (zero-padding is exact).
    adj_bf = adj.astype(jnp.bfloat16)
    # Hoisted x @ W0 (single XLA dot instead of per-row-tile recompute in-kernel).
    xw = jnp.dot(x, w0, preferred_element_type=jnp.float32)          # (n, h) f32
    xw_bf = _pad2(xw, n, hp).astype(jnp.bfloat16)
    b0_p = _pad2(b0.reshape(1, -1), 1, hp).astype(jnp.float32)
    wl_bf = jnp.pad(w_stack, ((0, 0), (0, hp - h), (0, hp - h))).astype(jnp.bfloat16)
    if num_layers > 1:
        gam_p = jnp.pad(bn_gamma, ((0, 0), (0, hp - h))).astype(jnp.float32)
        bet_p = jnp.pad(bn_beta, ((0, 0), (0, hp - h))).astype(jnp.float32)

    # Layer 0: GCNConv.  x0 residual kept in f32; z stream in bf16.
    x0, z_bf = _gcn_first_layer(adj_bf, xw_bf, b0_p, tm=tm, tk=tk)

    # GCN2Conv stack.  BN + activation of layer l are fused into layer l+1's
    # panel load via a folded (scale, shift) pair.
    scale = jnp.ones((1, hp), jnp.float32)
    shift = jnp.zeros((1, hp), jnp.float32)
    norm_input = False

    for l in range(num_layers):
        beta_l = math.log(theta / float(l + 1) + 1.0)
        z_bf, stats = _gcn2_layer(adj_bf, z_bf, x0, wl_bf[l], scale, shift,
                                  alpha=alpha, beta_l=beta_l,
                                  norm_input=norm_input, activation=activation,
                                  tm=tm, tk=tk)
        if l < num_layers - 1:
            # Reduce the tiny (r, 2, hp) partial stats and fold mean/var/gamma/beta
            # into one scale/shift applied inside the next layer's kernel.
            s = jnp.sum(stats, axis=0)                     # (2, hp)
            mean = s[0] / n
            var = s[1] / n - mean * mean                   # biased variance
            inv = jax.lax.rsqrt(var + eps)
            scale = (inv * gam_p[l]).reshape(1, hp)
            shift = (bet_p[l] - mean * inv * gam_p[l]).reshape(1, hp)
            norm_input = True

    return z_bf[:, :h].astype(jnp.float32)


# ----------------------------------------------------------------------------
# Pure-JAX reference (mirrors the PyTorch forward, f32 throughout)
# ----------------------------------------------------------------------------
def reference_forward(x, adj, w0, b0, w_stack, bn_gamma, bn_beta,
                      *, alpha, theta, activation):
    z = adj @ (x @ w0) + b0
    x0 = z
    L = w_stack.shape[0]
    for l in range(L):
        h = adj @ z
        out = (1.0 - alpha) * h + alpha * x0
        beta_l = math.log(theta / float(l + 1) + 1.0)
        z = (1.0 - beta_l) * out + beta_l * (out @ w_stack[l])
        if l < L - 1:
            mean = jnp.mean(z, axis=0, keepdims=True)
            var = jnp.mean((z - mean) ** 2, axis=0, keepdims=True)
            z = (z - mean) / jnp.sqrt(var + 1e-5) * bn_gamma[l] + bn_beta[l]
            if activation == "relu":
                z = jnp.maximum(z, 0.0)
            elif activation == "leaky_relu":
                z = jnp.where(z > 0.0, z, 0.01 * z)
            elif activation == "tanh":
                z = jnp.tanh(z)
    return z


if __name__ == "__main__":
    key = jax.random.PRNGKey(0)

    # Small shapes consistent with the module.
    N = 512        # num_nodes
    F_IN = 16      # input node-feature channels (data.x.size(1))
    H = 32         # num_hidden_channels
    L = 3          # num_layers
    ALPHA = 0.1
    THETA = 0.5
    ACTIVATION = "relu"

    k_x, k_e, k_w0, k_wl = jax.random.split(key, 4)

    # Node features [num_nodes, input_channels]
    x = jax.random.normal(k_x, (N, F_IN), dtype=jnp.float32)

    # Random undirected graph -> dense symmetric-normalized adjacency with
    # self-loops (plays the role of train_pos_edge_adj_t; GCN2Conv is built with
    # normalize=False so A_hat is pre-normalized).
    A = (jax.random.uniform(k_e, (N, N)) < 0.05).astype(jnp.float32)
    A = jnp.maximum(A, A.T)
    A = A.at[jnp.arange(N), jnp.arange(N)].set(0.0)
    A = A + jnp.eye(N, dtype=jnp.float32)
    deg = jnp.sum(A, axis=1)
    d_inv_sqrt = 1.0 / jnp.sqrt(deg)
    adj = A * d_inv_sqrt[:, None] * d_inv_sqrt[None, :]   # D^-1/2 (A+I) D^-1/2

    # Parameters:
    #   lins[0]  : GCNConv(F_IN, H)  -> W0 [F_IN, H], b0 [H]
    #   convs[l] : GCN2Conv(H, ...)  -> weight1 [H, H]  (shared_weights=True)
    #   batchnorms[l] (L-1 of them)  -> gamma [H], beta [H]
    w0 = jax.random.normal(k_w0, (F_IN, H), dtype=jnp.float32) * (1.0 / math.sqrt(F_IN))
    b0 = jnp.zeros((H,), dtype=jnp.float32)
    w_stack = jax.random.normal(k_wl, (L, H, H), dtype=jnp.float32) * (1.0 / math.sqrt(H))
    bn_gamma = jnp.ones((L - 1, H), dtype=jnp.float32)
    bn_beta = jnp.zeros((L - 1, H), dtype=jnp.float32)

    z = gcnii_forward(x, adj, w0, b0, w_stack, bn_gamma, bn_beta,
                      alpha=ALPHA, theta=THETA, activation=ACTIVATION)
    z = jax.block_until_ready(z)

    z_ref = reference_forward(x, adj, w0, b0, w_stack, bn_gamma, bn_beta,
                              alpha=ALPHA, theta=THETA, activation=ACTIVATION)

    assert z.shape == (N, H)
    # bf16 adjacency / z-stream / weight matmuls -> compare with a relative-norm
    # tolerance plus an elementwise max-error check (normalized by the global
    # scale so near-zero ReLU boundary elements don't produce false alarms).
    rel_err = float(jnp.linalg.norm(z - z_ref) / (jnp.linalg.norm(z_ref) + 1e-12))
    max_err = float(jnp.max(jnp.abs(z - z_ref)))
    ref_scale = float(jnp.max(jnp.abs(z_ref))) + 1e-12
    assert rel_err < 5e-2, f"Pallas kernel mismatch vs reference: rel_err={rel_err}"
    assert max_err / ref_scale < 1e-1, (
        f"Pallas kernel elementwise mismatch: max_err={max_err}, scale={ref_scale}")

    print("KERNEL_OK")
</pallas_src>

<mosaic_0001>
module attributes {stable_mosaic.version = 11 : i64} {
  func.func @_gcn_first_kernel(%arg0: i32, %arg1: i32, %arg2: memref<256x512xbf16, #tpu.memory_space<vmem>>, %arg3: memref<512x128xbf16, #tpu.memory_space<vmem>>, %arg4: memref<1x128xf32, #tpu.memory_space<vmem>>, %arg5: memref<256x128xf32, #tpu.memory_space<vmem>>, %arg6: memref<256x128xbf16, #tpu.memory_space<vmem>>, %arg7: memref<256x128xf32, #tpu.memory_space<vmem>>) attributes {dimension_semantics = [#tpu.dimension_semantics<parallel>, #tpu.dimension_semantics<arbitrary>], iteration_bounds = array<i64: 2, 1>, scalar_prefetch = 0 : i64, scratch_operands = 1 : i64, tpu.core_type = #tpu.core_type<tc>, window_params = [{transform_indices = @transform_0, window_bounds = array<i64: 256, 512>}, {transform_indices = @transform_1, window_bounds = array<i64: 512, 128>}, {pipeline_mode = #tpu.pipeline_mode<synchronous>, transform_indices = @transform_2, window_bounds = array<i64: 1, 128>}, {transform_indices = @transform_3, window_bounds = array<i64: 256, 128>}, {transform_indices = @transform_4, window_bounds = array<i64: 256, 128>}]} {
    %c0_i32 = arith.constant 0 : i32
    %0 = arith.cmpi eq, %arg1, %c0_i32 : i32
    %1 = arith.extui %0 : i1 to i32
    %c0_i32_0 = arith.constant 0 : i32
    %2 = arith.cmpi ne, %1, %c0_i32_0 : i32
    scf.if %2 {
      %cst_10 = arith.constant 0.000000e+00 : f32
      %12 = vector.broadcast %cst_10 : f32 to vector<256x128xf32>
      %c0_11 = arith.constant 0 : index
      %c0_12 = arith.constant 0 : index
      %13 = vector.load %arg7[%c0_11, %c0_12] : memref<256x128xf32, #tpu.memory_space<vmem>>, vector<256x128xf32>
      tpu.vector_store %arg7[%c0_11, %c0_12], %12 {strides = array<i32>} : memref<256x128xf32, #tpu.memory_space<vmem>>, vector<256x128xf32>,
    } else {
    }
    %c0 = arith.constant 0 : index
    %c0_1 = arith.constant 0 : index
    %3 = vector.load %arg7[%c0, %c0_1] : memref<256x128xf32, #tpu.memory_space<vmem>>, vector<256x128xf32>
    %c0_2 = arith.constant 0 : index
    %c0_3 = arith.constant 0 : index
    %4 = vector.load %arg2[%c0_2, %c0_3] : memref<256x512xbf16, #tpu.memory_space<vmem>>, vector<256x512xbf16>
    %c0_4 = arith.constant 0 : index
    %c0_5 = arith.constant 0 : index
    %5 = vector.load %arg3[%c0_4, %c0_5] : memref<512x128xbf16, #tpu.memory_space<vmem>>, vector<512x128xbf16>
    %cst = arith.constant dense<0.000000e+00> : vector<256x128xf32>
    %6 = tpu.matmul %4, %5, %cst {dimension_numbers = #tpu.dot_dimension_numbers<[1], [0], [0], [1], [0, 0, 1, 1], [], []>} : vector<256x512xbf16>, vector<512x128xbf16>, vector<256x128xf32> -> vector<256x128xf32>
    %7 = arith.addf %3, %6 : vector<256x128xf32>
    %c0_6 = arith.constant 0 : index
    %c0_7 = arith.constant 0 : index
    %8 = vector.load %arg7[%c0_6, %c0_7] : memref<256x128xf32, #tpu.memory_space<vmem>>, vector<256x128xf32>
    tpu.vector_store %arg7[%c0_6, %c0_7], %7 {strides = array<i32>} : memref<256x128xf32, #tpu.memory_space<vmem>>, vector<256x128xf32>,
    %c0_i32_8 = arith.constant 0 : i32
    %9 = arith.cmpi eq, %arg1, %c0_i32_8 : i32
    %10 = arith.extui %9 : i1 to i32
    %c0_i32_9 = arith.constant 0 : i32
    %11 = arith.cmpi ne, %10, %c0_i32_9 : i32
    scf.if %11 {
      %c0_10 = arith.constant 0 : index
      %c0_11 = arith.constant 0 : index
      %12 = vector.load %arg7[%c0_10, %c0_11] : memref<256x128xf32, #tpu.memory_space<vmem>>, vector<256x128xf32>
      %c0_12 = arith.constant 0 : index
      %c0_13 = arith.constant 0 : index
      %13 = vector.load %arg4[%c0_12, %c0_13] : memref<1x128xf32, #tpu.memory_space<vmem>>, vector<1x128xf32>
      %14 = vector.broadcast %13 : vector<1x128xf32> to vector<256x128xf32>
      %15 = arith.addf %12, %14 : vector<256x128xf32>
      %c0_14 = arith.constant 0 : index
      %c0_15 = arith.constant 0 : index
      %16 = vector.load %arg5[%c0_14, %c0_15] : memref<256x128xf32, #tpu.memory_space<vmem>>, vector<256x128xf32>
      tpu.vector_store %arg5[%c0_14, %c0_15], %15 {strides = array<i32>} : memref<256x128xf32, #tpu.memory_space<vmem>>, vector<256x128xf32>,
      %17 = arith.truncf %15 : vector<256x128xf32> to vector<256x128xbf16>
      %c0_16 = arith.constant 0 : index
      %c0_17 = arith.constant 0 : index
      %18 = vector.load %arg6[%c0_16, %c0_17] : memref<256x128xbf16, #tpu.memory_space<vmem>>, vector<256x128xbf16>
      tpu.vector_store %arg6[%c0_16, %c0_17], %17 {strides = array<i32>} : memref<256x128xbf16, #tpu.memory_space<vmem>>, vector<256x128xbf16>,
    } else {
    }
    return
  }
  func.func @transform_0(%arg0: i32, %arg1: i32) -> (i32, i32) {
    %c0_i32 = arith.constant 0 : i32
    return %arg0, %arg1 : i32, i32
  }
  func.func @transform_1(%arg0: i32, %arg1: i32) -> (i32, i32) {
    %c0_i32 = arith.constant 0 : i32
    %c0_i32_0 = arith.constant 0 : i32
    return %arg1, %c0_i32 : i32, i32
  }
  func.func @transform_2(%arg0: i32, %arg1: i32) -> (i32, i32) {
    %c0_i32 = arith.constant 0 : i32
    %c0_i32_0 = arith.constant 0 : i32
    %c0_i32_1 = arith.constant 0 : i32
    return %c0_i32, %c0_i32_0 : i32, i32
  }
  func.func @transform_3(%arg0: i32, %arg1: i32) -> (i32, i32) {
    %c0_i32 = arith.constant 0 : i32
    %c0_i32_0 = arith.constant 0 : i32
    return %arg0, %c0_i32 : i32, i32
  }
  func.func @transform_4(%arg0: i32, %arg1: i32) -> (i32, i32) {
    %c0_i32 = arith.constant 0 : i32
    %c0_i32_0 = arith.constant 0 : i32
    return %arg0, %c0_i32 : i32, i32
  }
}

</mosaic_0001>

<bundles_post_ra>
// kernel: tpu_custom_call.1
= control target key start
LH: loop header
LB: loop body
LE: loop exit
PB: predicated region body
PF: predicated region fallthrough
CT: control target
= control target key end

     0   :  { %s3037_s0 = inlined_call_operand.hbm [shape: bf16[512,512], index: 0, kind: input, shape index: {}]   ;;  %s3038_s1 = inlined_call_operand.hbm [shape: bf16[512,128], index: 1, kind: input, shape index: {}]   ;;  %s3039_s2 = inlined_call_operand.vmem [shape: f32[1,128], index: 2, kind: input, shape index: {}]   ;;  %s3040_s3 = inlined_call_operand.hbm [shape: f32[512,128], index: 3, kind: output, shape index: {0}]   ;;  %s3041_s4 = inlined_call_operand.hbm [shape: bf16[512,128], index: 4, kind: output, shape index: {1}]  }
   0x1   :  { %3043 = sst [smem:[#allocation16_spill]] %s3038_s1 }
   0x2   :  { %10 = vsyncpa [#allocation4], 0 }
   0x3   :  { %12 = vsyncpa [#allocation4 + $0x1], 0 }
   0x4   :  { %13 = vsyncpa [#allocation7], 0 }
   0x5   :  { %14 = vsyncpa [#allocation5], 0 }
   0x6   :  { %16 = vsyncpa [#allocation5 + $0x1], 0 }
   0x7   :  { %17 = vsyncpa [#allocation10], 0 }
   0x8   :  { %19 = vsyncpa [#allocation10 + $0x1], 0  ;;  %s2640_s15 = smov 0   ;;  %s2642_s16 = smov 0  }
   0x9   :  { %s2644_s17 = smov 0   ;;  %s2646_s18 = smov 0  }
   0xa   :  { %s2648_s19 = smov 0   ;;  %s2650_s20 = smov 0  }
   0xb LB: > { %s1738_s21 = sadd.s32 4294967295, %s2604_s20   ;;  %s1739_s22 = sadd.s32 4294967294, %s2604_s20   ;;  %s2604_s20 = sphi %s2650_s20, %s25_s20   ;;  %s2600_s19 = sphi %s2648_s19, %s3058_s19   ;;  %s2596_s18 = sphi %s2646_s18, %s3057_s18   ;;  %s2592_s17 = sphi %s2644_s17, %s3056_s17   ;;  %s2588_s16 = sphi %s2642_s16, %s3055_s16   ;;  %s2584_s15 = sphi %s2640_s15, %s3054_s15  }
   0xc   : > { %p59_p0 = scmp.ne.s32.totalorder %s2588_s16, %s2584_s15  ;;  %p2674_p1 = scmp.eq.s32.totalorder %s1738_s21, 0 }
   0xd   : > { %p2678_p2 = scmp.eq.s32.totalorder %s1738_s21, 1  ;;  %p136_p3 = scmp.eq.s32.totalorder %s1739_s22, 1 }
   0xe   : > { %p2684_p4 = por %p2674_p1, %p59_p0  ;;  %p1740_p5 = scmp.ge.s32.totalorder %s2604_s20, 1 }
   0xf   : > { %p2689_p6 = por %p136_p3, %p59_p0  ;;  %p169_p7 = scmp.lt.s32.totalorder %s2604_s20, 3 }
  0x10   : > { %s3048_s1 = sld [smem:[#allocation16_spill]]  ;;  %s2606_s5 = smov [#allocation6]  }
  0x11   : > { %p2697_p8 = pnand %p1740_p5, %p169_p7  ;;  %s185_s6 = sshll.u32 %s2606_s5, 4  ;;  %s186_s6 = int_to_ptr.vmem [resolvable:$true] %s185_s6 }
  0x12   : > { %p1742_p11 = scmp.ge.s32.totalorder %s2604_s20, 2  ;;  %s2607_s7 = smov 64  }
  0x13   : > { %p2349_p9 = pneg %p2697_p8  ;;  %s2608_s8 = smov 4  }
  0x14   : > { %s37_s9 = sadd.s32 1, %s2600_s19  ;;  %s46_s10 = sadd.s32 1, %s2592_s17 }
  0x15   : > { %p2350_p10 = pnand %p2349_p9, %p2674_p1  ;;  %p39_p12 = scmp.ge.s32.totalorder %s37_s9, 2 }
  0x16   : > { %s183_s29 = sshll.u32 %s3048_s1, 4  ;;  %p53_p13 = scmp.ne.s32.totalorder %s2592_s17, %s2588_s16  ;;  %s184_s29 = int_to_ptr.hbm [resolvable:$true] %s183_s29 }
  0x17   : > { %2352 = dma.hbm_to_vmem [thread:$0]  (!%p2350_p10), %s184_s29, 4096, %s186_s6, [#allocation7], %s2607_s7, %s2607_s7, %s2608_s8  }
  0x18   : > { %p54_p0 = scmp.eq.s32.totalorder %s2604_s20, 0  ;;  %s3060_s9 = smov (%p39_p12, %s37_s9), 0 }
  0x19   : > { %3050 = sst [smem:[#allocation15_spill]] %s3060_s9  ;;  %p2719_p5 = por %p2678_p2, %p53_p13 }
  0x1a   : > { %p2713_p3 = por %p54_p0, %p53_p13  ;;  %s41_s13 = ssub.s32 %s2600_s19, %s3060_s9 }
  0x1b   : > { %p2365_p7 = scmp.lt.s32.totalorder %s2604_s20, 2  ;;  %p44_p9 = scmp.eq.s32.totalorder %s41_s13, 0 }
  0x1c   : > { %s202_s14 = sand.u32 1, %s2592_s17   ;;  %s2145_s27 = sshll.u32 %s2600_s19, 9 }
  0x1d   : > { %s1743_s21 = sshll.u32 %s202_s14, 9  ;;  %s214_s5 = scalar_lea.hbm %s3037_s0, %s2145_s27 }
  0x1e   : > { %s2728_s22 = scalar_select %p44_p9, %s2592_s17, %s46_s10  }
  0x1f   : > { %s206_s6 = scalar_lea.vmem [#allocation3], %s1743_s21  ;;  %s215_s24 = sshll.u32 %s214_s5, 4  ;;  %s216_s24 = int_to_ptr.hbm [resolvable:$true] %s215_s24 }
  0x20   : > { %s217_s7 = sshll.u32 %s206_s6, 4  ;;  %p2354_p2 = pnand %p2365_p7, %p2713_p3  ;;  %s218_s7 = int_to_ptr.vmem [resolvable:$true] %s217_s7 }
  0x21   : > { %s203_s8 = scalar_lea.sflag [#allocation4], %s202_s14  ;;  %s2609_s1 = smov 256  }
  0x22   : > { %s2610_s9 = smov 16   ;;  %229 = sbr.rel (%p2697_p8) target bundleno = 479 (0x1df), region = 32 }
  0x23   : > { %2356 = dma.hbm_to_vmem [thread:$0]  (!%p2354_p2), %s216_s24, 8192, %s218_s7, %s203_s8, %s2609_s1, %s2609_s1, %s2610_s9  }
  0x24   : > { %s2739_s10 = sand.u32 (!%p2697_p8), 1, %s2588_s16  }
  0x25   : > { %s1748_s13 = sshll.u32 (!%p2697_p8), %s2739_s10, 9  ;;  %s232_s21 = scalar_lea.sflag (!%p2697_p8), [#allocation4], %s2739_s10 }
  0x26   : > { %s2743_s27 = scalar_lea.vmem (!%p2697_p8), [#allocation3], %s1748_s13 }
  0x27   : > { %2567 = dma.done.wait (%p2684_p4), %s232_s21, 8192  }
  0x28   : > { %2569 = vsyncadd (%p2684_p4), %s232_s21, 4294959104 }
  0x29   : > { %2571 = dma.done.wait (%p2674_p1), [#allocation7], 4096  }
  0x2a   : > { %2573 = vsyncadd (%p2674_p1), [#allocation7], 4294963200  ;;  %v2217_v0 = vld [vmem:[#allocation6 + $0x38] sm:$0xff]  ;;  %v2216_v4 = vld [vmem:[#allocation6 + $0x30] sm:$0xff]  ;;  %s1750_s1 = sshll.u32 %s2739_s10, 8  ;;  %s1751_s9 = sshll.u32 %s2739_s10, 7 }
  0x2b   : > { %v2225_v1 = vld [vmem:[#allocation6 + $0x78] sm:$0xff]  ;;  %984 = vmatpush.bf16.msra.mxu0 %v2217_v0  ;;  %v2224_v5 = vld [vmem:[#allocation6 + $0x70] sm:$0xff]  ;;  %v2215_v8 = vld [vmem:[#allocation6 + $0x28] sm:$0xff]  ;;  %s2840_s30 = scalar_lea.vmem [#allocation8], %s1750_s1  ;;  %s2846_s11 = scalar_lea.vmem [#allocation9], %s1751_s9 }
  0x2c   : > { %v2233_v2 = vld [vmem:[#allocation6 + $0xb8] sm:$0xff]  ;;  %1073 = vmatpush.bf16.msra.mxu1 %v2225_v1  ;;  %v2232_v6 = vld [vmem:[#allocation6 + $0xb0] sm:$0xff]  ;;  %v2223_v9 = vld [vmem:[#allocation6 + $0x68] sm:$0xff]  ;;  %s2242_s14 = sshll.u32 %s2596_s18, 8  ;;  %s2243_s28 = sshll.u32 %s2596_s18, 7 }
  0x2d   : > { %v2241_v3 = vld [vmem:[#allocation6 + $0xf8] sm:$0xff]  ;;  %1162 = vmatpush.bf16.msra.mxu2 %v2233_v2  ;;  %v2240_v7 = vld [vmem:[#allocation6 + $0xf0] sm:$0xff]  ;;  %v2231_v10 = vld [vmem:[#allocation6 + $0xa8] sm:$0xff]  ;;  %s1588_s6 = scalar_lea.hbm %s3040_s3, %s2242_s14  ;;  %s1589_s7 = sshll.u32 %s2840_s30, 4  ;;  %s2978_s7 = int_to_ptr.vmem [resolvable:$true] %s1589_s7 }
  0x2e   : > { %1251 = vmatpush.bf16.msra.mxu3 %v2241_v3  ;;  %v2239_v11 = vld [vmem:[#allocation6 + $0xe8] sm:$0xff]  ;;  %v2214_v12 = vld [vmem:[#allocation6 + $0x20] sm:$0xff]  ;;  %v2213_v16 = vld [vmem:[#allocation6 + $0x18] sm:$0xff]  ;;  %s1605_s13 = scalar_lea.hbm %s3041_s4, %s2243_s28  ;;  %s1591_s21 = sshll.u32 %s1588_s6, 4  ;;  %s1592_s21 = int_to_ptr.hbm [resolvable:$true] %s1591_s21 }
  0x2f   : > { %985 = vmatpush.bf16.msra.mxu0 %v2216_v4  ;;  %v2222_v13 = vld [vmem:[#allocation6 + $0x60] sm:$0xff]  ;;  %v2221_v17 = vld [vmem:[#allocation6 + $0x58] sm:$0xff]  ;;  %v2212_v20 = vld [vmem:[#allocation6 + $0x10] sm:$0xff]  ;;  %s1606_s18 = sshll.u32 %s2846_s11, 4  ;;  %s1572_s1 = scalar_lea.sflag [#allocation5], %s2739_s10  ;;  %s2982_s18 = int_to_ptr.vmem [resolvable:$true] %s1606_s18 }
  0x30   : > { %1074 = vmatpush.bf16.msra.mxu1 %v2224_v5  ;;  %v2230_v14 = vld [vmem:[#allocation6 + $0xa0] sm:$0xff]  ;;  %v2229_v18 = vld [vmem:[#allocation6 + $0x98] sm:$0xff]  ;;  %v2220_v21 = vld [vmem:[#allocation6 + $0x50] sm:$0xff]  ;;  %s2500_s23 = sshra.s32 %s1592_s21, 4  ;;  %s2506_s28 = scalar_lea.hbm %s3040_s3, 512  ;;  %s2501_s23 = int_to_ptr.hbm [resolvable:$true] %s2500_s23 }
  0x31   : > { %1163 = vmatpush.bf16.msra.mxu2 %v2232_v6  ;;  %v2238_v15 = vld [vmem:[#allocation6 + $0xe0] sm:$0xff]  ;;  %v2237_v19 = vld [vmem:[#allocation6 + $0xd8] sm:$0xff]  ;;  %v2228_v22 = vld [vmem:[#allocation6 + $0x90] sm:$0xff]  ;;  %s2502_s25 = scalar_lea.hbm %s2501_s23, 256  ;;  %p2507_p10 = scmp.lt.s32.totalorder %s2501_s23, %s3040_s3 }
  0x32   : > { %1252 = vmatpush.bf16.msra.mxu3 %v2240_v7  ;;  %v2236_v23 = vld [vmem:[#allocation6 + $0xd0] sm:$0xff]  ;;  %v2211_v24 = vld [vmem:[#allocation6 + $0x8] sm:$0xff]  ;;  %v2210_v28 = vld [vmem:[#allocation6] sm:$0xff]  ;;  %p2503_p1 = scmp.ne.s32.totalorder %s2501_s23, %s2502_s25  ;;  %p2508_p12 = scmp.lt.s32.totalorder %s2506_s28, %s2502_s25 }
  0x33   : > { %986 = vmatpush.bf16.msra.mxu0 %v2215_v8  ;;  %v2219_v25 = vld [vmem:[#allocation6 + $0x48] sm:$0xff]  ;;  %v2218_v29 = vld [vmem:[#allocation6 + $0x40] sm:$0xff]  ;;  %v2148_v33 = vld [vmem:[%s2743_s27 + $0xc] sm:$0xf0] }
  0x34   : > { %1075 = vmatpush.bf16.msra.mxu1 %v2223_v9  ;;  %v2227_v26 = vld [vmem:[#allocation6 + $0x88] sm:$0xff]  ;;  %v2226_v30 = vld [vmem:[#allocation6 + $0x80] sm:$0xff]  ;;  %v1756_v35 = vld [vmem:[%s2743_s27 + $0x10] sm:$0xf0]  ;;  %p2504_p4 = pnand %p2503_p1, %p2719_p5  ;;  %p2509_p13 = por %p2508_p12, %p2507_p10 }
  0x35   : > { %1164 = vmatpush.bf16.msra.mxu2 %v2231_v10  ;;  %v2235_v27 = vld [vmem:[#allocation6 + $0xc8] sm:$0xff]  ;;  %v2234_v31 = vld [vmem:[#allocation6 + $0xc0] sm:$0xff]  ;;  %v2149_v37 = vld [vmem:[%s2743_s27 + $0x14] sm:$0xf0] }
  0x36   : > { %1253 = vmatpush.bf16.msra.mxu3 %v2239_v11  ;;  %v1754_v32 = vld [vmem:[%s2743_s27] sm:$0xf]  ;;  %v2146_v34 = vld [vmem:[%s2743_s27 + $0x4] sm:$0xf]  ;;  %v1762_v36 = vld [vmem:[%s2743_s27 + $0x8] sm:$0xf]  ;;  %p2505_p8 = pneg %p2504_p4 }
  0x37   : > { %987 = vmatpush.bf16.msra.mxu0 %v2214_v12  ;;  %v2147_v38 = vld [vmem:[%s2743_s27 + $0xc] sm:$0xf]  ;;  %v1764_v39 = vld [vmem:[%s2743_s27 + $0x18] sm:$0xf0]  ;;  %v1755_v40 = vor.u32 %v2148_v33, %v1754_v32  ;;  %v1759_v41 = vor.u32 %v2146_v34, %v1756_v35  ;;  %v1763_v42 = vor.u32 %v2149_v37, %v1762_v36  ;;  %v1770_v44 = vld [vmem:[%s2743_s27 + $0x20] sm:$0xf] }
  0x38   : > { %1076 = vmatpush.bf16.msra.mxu1 %v2222_v13  ;;  %v1767_v43 = vor.u32 %v2147_v38, %v1764_v39  ;;  %v2152_v45 = vld [vmem:[%s2743_s27 + $0x2c] sm:$0xf0]  ;;  %v2150_v46 = vld [vmem:[%s2743_s27 + $0x24] sm:$0xf]  ;;  %v1772_v47 = vld [vmem:[%s2743_s27 + $0x30] sm:$0xf0]  ;;  %p2510_p0 = pnand %p2509_p13, %p2505_p8 }
  0x39   : > { %1165 = vmatpush.bf16.msra.mxu2 %v2230_v14  ;;  %v1778_v48 = vld [vmem:[%s2743_s27 + $0x28] sm:$0xf]  ;;  %v2153_v49 = vld [vmem:[%s2743_s27 + $0x34] sm:$0xf0]  ;;  %v2151_v50 = vld [vmem:[%s2743_s27 + $0x2c] sm:$0xf]  ;;  %v1771_v52 = vor.u32 %v2152_v45, %v1770_v44  ;;  %v1775_v53 = vor.u32 %v2150_v46, %v1772_v47 }
  0x3a   : > { %1254 = vmatpush.bf16.msra.mxu3 %v2238_v15  ;;  %v1780_v51 = vld [vmem:[%s2743_s27 + $0x38] sm:$0xf0]  ;;  %v1779_v54 = vor.u32 %v2153_v49, %v1778_v48  ;;  %v1786_v56 = vld [vmem:[%s2743_s27 + $0x40] sm:$0xf]  ;;  %v2156_v57 = vld [vmem:[%s2743_s27 + $0x4c] sm:$0xf0] }
  0x3b   : > { %988 = vmatpush.bf16.msra.mxu0 %v2213_v16  ;;  %v1783_v55 = vor.u32 %v2151_v50, %v1780_v51  ;;  %v2154_v58 = vld [vmem:[%s2743_s27 + $0x44] sm:$0xf]  ;;  %v1788_v59 = vld [vmem:[%s2743_s27 + $0x50] sm:$0xf0]  ;;  %v1794_v60 = vld [vmem:[%s2743_s27 + $0x48] sm:$0xf]  ;;  %v1787_v0 = vor.u32 %v2156_v57, %v1786_v56 }
  0x3c   : > { %1077 = vmatpush.bf16.msra.mxu1 %v2221_v17  ;;  %v2157_v61 = vld [vmem:[%s2743_s27 + $0x54] sm:$0xf0]  ;;  %v2155_v62 = vld [vmem:[%s2743_s27 + $0x4c] sm:$0xf]  ;;  %v1796_v63 = vld [vmem:[%s2743_s27 + $0x58] sm:$0xf0]  ;;  %v1791_v1 = vor.u32 %v2154_v58, %v1788_v59 }
  0x3d   : > { %1166 = vmatpush.bf16.msra.mxu2 %v2229_v18  ;;  %v1795_v2 = vor.u32 %v2157_v61, %v1794_v60  ;;  %v1799_v3 = vor.u32 %v2155_v62, %v1796_v63  ;;  %v1802_v4 = vld [vmem:[%s2743_s27 + $0x60] sm:$0xf]  ;;  %v2160_v5 = vld [vmem:[%s2743_s27 + $0x6c] sm:$0xf0]  ;;  %v2158_v6 = vld [vmem:[%s2743_s27 + $0x64] sm:$0xf] }
  0x3e   : > { %1255 = vmatpush.bf16.msra.mxu3 %v2237_v19  ;;  %v1804_v7 = vld [vmem:[%s2743_s27 + $0x70] sm:$0xf0]  ;;  %v1810_v8 = vld [vmem:[%s2743_s27 + $0x68] sm:$0xf]  ;;  %v2161_v9 = vld [vmem:[%s2743_s27 + $0x74] sm:$0xf0]  ;;  %v1803_v12 = vor.u32 %v2160_v5, %v1802_v4 }
  0x3f   : > { %989 = vmatpush.bf16.msra.mxu0 %v2212_v20  ;;  %v2159_v10 = vld [vmem:[%s2743_s27 + $0x6c] sm:$0xf]  ;;  %v1812_v11 = vld [vmem:[%s2743_s27 + $0x78] sm:$0xf0]  ;;  %v1807_v13 = vor.u32 %v2158_v6, %v1804_v7  ;;  %v1811_v14 = vor.u32 %v2161_v9, %v1810_v8  ;;  %v1818_v16 = vld [vmem:[%s2743_s27 + $0x80] sm:$0xf] }
  0x40   : > { %1078 = vmatpush.bf16.msra.mxu1 %v2220_v21  ;;  %v1815_v15 = vor.u32 %v2159_v10, %v1812_v11  ;;  %v2164_v17 = vld [vmem:[%s2743_s27 + $0x8c] sm:$0xf0]  ;;  %v2162_v18 = vld [vmem:[%s2743_s27 + $0x84] sm:$0xf]  ;;  %v1820_v19 = vld [vmem:[%s2743_s27 + $0x90] sm:$0xf0] }
  0x41   : > { %1167 = vmatpush.bf16.msra.mxu2 %v2228_v22  ;;  %v1826_v20 = vld [vmem:[%s2743_s27 + $0x88] sm:$0xf]  ;;  %v2165_v21 = vld [vmem:[%s2743_s27 + $0x94] sm:$0xf0]  ;;  %v2163_v22 = vld [vmem:[%s2743_s27 + $0x8c] sm:$0xf] }
  0x42   : > { %1256 = vmatpush.bf16.msra.mxu3 %v2236_v23  ;;  %v1828_v23 = vld [vmem:[%s2743_s27 + $0x98] sm:$0xf0]  ;;  %v1842_v32 = vld [vmem:[%s2743_s27 + $0xa8] sm:$0xf]  ;;  %v2169_v33 = vld [vmem:[%s2743_s27 + $0xb4] sm:$0xf0] }
  0x43   : > { %990 = vmatpush.bf16.msra.mxu0 %v2211_v24  ;;  %v1819_v24 = vor.u32 %v2164_v17, %v1818_v16  ;;  %v2167_v34 = vld [vmem:[%s2743_s27 + $0xac] sm:$0xf]  ;;  %v1844_v35 = vld [vmem:[%s2743_s27 + $0xb8] sm:$0xf0]  ;;  %v1843_v38 = vor.u32 %v2169_v33, %v1842_v32  ;;  %v1858_v44 = vld [vmem:[%s2743_s27 + $0xc8] sm:$0xf] }
  0x44   : > { %1079 = vmatpush.bf16.msra.mxu1 %v2219_v25  ;;  %v1823_v25 = vor.u32 %v2162_v18, %v1820_v19  ;;  %v1847_v39 = vor.u32 %v2167_v34, %v1844_v35  ;;  %v2173_v45 = vld [vmem:[%s2743_s27 + $0xd4] sm:$0xf0]  ;;  %v2171_v46 = vld [vmem:[%s2743_s27 + $0xcc] sm:$0xf]  ;;  %v1860_v47 = vld [vmem:[%s2743_s27 + $0xd8] sm:$0xf0] }
  0x45   : > { %1168 = vmatpush.bf16.msra.mxu2 %v2227_v26  ;;  %v1827_v26 = vor.u32 %v2165_v21, %v1826_v20  ;;  %v1859_v50 = vor.u32 %v2173_v45, %v1858_v44  ;;  %v1863_v51 = vor.u32 %v2171_v46, %v1860_v47  ;;  %v1874_v56 = vld [vmem:[%s2743_s27 + $0xe8] sm:$0xf]  ;;  %v2177_v57 = vld [vmem:[%s2743_s27 + $0xf4] sm:$0xf0]  ;;  %v2175_v58 = vld [vmem:[%s2743_s27 + $0xec] sm:$0xf] }
  0x46   : > { %1257 = vmatpush.bf16.msra.mxu3 %v2235_v27  ;;  %v1831_v27 = vor.u32 %v2163_v22, %v1828_v23  ;;  %v1876_v59 = vld [vmem:[%s2743_s27 + $0xf8] sm:$0xf0]  ;;  %v1875_v62 = vor.u32 %v2177_v57, %v1874_v56  ;;  %v1890_v4 = vld [vmem:[%s2743_s27 + $0x108] sm:$0xf]  ;;  %v2181_v5 = vld [vmem:[%s2743_s27 + $0x114] sm:$0xf0] }
  0x47   : > { %991 = vmatpush.bf16.msra.mxu0 %v2210_v28  ;;  %v1834_v28 = vld [vmem:[%s2743_s27 + $0xa0] sm:$0xf]  ;;  %v1879_v63 = vor.u32 %v2175_v58, %v1876_v59  ;;  %v2179_v6 = vld [vmem:[%s2743_s27 + $0x10c] sm:$0xf]  ;;  %v1892_v7 = vld [vmem:[%s2743_s27 + $0x118] sm:$0xf0] }
  0x48   : > { %1080 = vmatpush.bf16.msra.mxu1 %v2218_v29  ;;  %v2168_v29 = vld [vmem:[%s2743_s27 + $0xac] sm:$0xf0]  ;;  %v2829_v18 = vld [vmem:[%s3039_s2] ss:$0 sm:$0xff]  ;;  %v1922_v56 = vld [vmem:[%s2743_s27 + $0x148] sm:$0xf] }
  0x49   : > { %1169 = vmatpush.bf16.msra.mxu2 %v2226_v30  ;;  %v2166_v30 = vld [vmem:[%s2743_s27 + $0xa4] sm:$0xf]  ;;  %v1835_v36 = vor.u32 %v2168_v29, %v1834_v28  ;;  %v1898_v22 = vld [vmem:[%s2743_s27 + $0x120] sm:$0xf]  ;;  %v2184_v23 = vld [vmem:[%s2743_s27 + $0x12c] sm:$0xf0] }
  0x4a   : > { %1258 = vmatpush.bf16.msra.mxu3 %v2234_v31  ;;  %992 = vmatmul.bf16.vlgmr.msra.gmra.mxu0 %v1755_v40  ;;  %v1836_v31 = vld [vmem:[%s2743_s27 + $0xb0] sm:$0xf0]  ;;  %v1850_v40 = vld [vmem:[%s2743_s27 + $0xc0] sm:$0xf]  ;;  %v2185_v28 = vld [vmem:[%s2743_s27 + $0x134] sm:$0xf0]  ;;  %v1899_v34 = vor.u32 %v2184_v23, %v1898_v22 }
  0x4b   : > { %1081 = vmatmul.bf16.vlgmr.msra.gmra.mxu1 %v1759_v41  ;;  %v1839_v37 = vor.u32 %v2166_v30, %v1836_v31  ;;  %v2172_v41 = vld [vmem:[%s2743_s27 + $0xcc] sm:$0xf0]  ;;  %v2183_v29 = vld [vmem:[%s2743_s27 + $0x12c] sm:$0xf]  ;;  %v1908_v30 = vld [vmem:[%s2743_s27 + $0x138] sm:$0xf0] }
  0x4c   : > { %1170 = vmatmul.bf16.vlgmr.msra.gmra.mxu2 %v1763_v42  ;;  %v2170_v42 = vld [vmem:[%s2743_s27 + $0xc4] sm:$0xf]  ;;  %v1851_v48 = vor.u32 %v2172_v41, %v1850_v40  ;;  %v1911_v40 = vor.u32 %v2183_v29, %v1908_v30  ;;  %v2189_v57 = vld [vmem:[%s2743_s27 + $0x154] sm:$0xf0]  ;;  %v2187_v58 = vld [vmem:[%s2743_s27 + $0x14c] sm:$0xf] }
  0x4d   : > { %1259 = vmatmul.bf16.vlgmr.msra.gmra.mxu3 %v1767_v43  ;;  %v1852_v43 = vld [vmem:[%s2743_s27 + $0xd0] sm:$0xf0]  ;;  %v1924_v59 = vld [vmem:[%s2743_s27 + $0x158] sm:$0xf0]  ;;  %v1938_v22 = vld [vmem:[%s2743_s27 + $0x168] sm:$0xf] }
  0x4e   : > { %v1855_v49 = vor.u32 %v2170_v42, %v1852_v43  ;;  %v2193_v23 = vld [vmem:[%s2743_s27 + $0x174] sm:$0xf0] }
  0x5a   : > { %997 = vmatmul.bf16.gmra.mxu0 %v1771_v52  ;;  %v1866_v52 = vld [vmem:[%s2743_s27 + $0xe0] sm:$0xf] }
  0x5b   : > { %1086 = vmatmul.bf16.gmra.mxu1 %v1775_v53  ;;  %v2176_v53 = vld [vmem:[%s2743_s27 + $0xec] sm:$0xf0] }
  0x5c   : > { %1175 = vmatmul.bf16.gmra.mxu2 %v1779_v54  ;;  %v2174_v54 = vld [vmem:[%s2743_s27 + $0xe4] sm:$0xf]  ;;  %v1867_v60 = vor.u32 %v2176_v53, %v1866_v52  ;;  %v2188_v52 = vld [vmem:[%s2743_s27 + $0x14c] sm:$0xf0] }
  0x5d   : > { %1264 = vmatmul.bf16.gmra.mxu3 %v1783_v55  ;;  %v1868_v55 = vld [vmem:[%s2743_s27 + $0xf0] sm:$0xf0] }
  0x5e   : > { %v1871_v61 = vor.u32 %v2174_v54, %v1868_v55  ;;  %v2186_v54 = vld [vmem:[%s2743_s27 + $0x144] sm:$0xf]  ;;  %v1916_v55 = vld [vmem:[%s2743_s27 + $0x150] sm:$0xf0] }
  0x6a   : > { %1002 = vmatmul.bf16.gmra.mxu0 %v1787_v0  ;;  %v1882_v0 = vld [vmem:[%s2743_s27 + $0x100] sm:$0xf] }
  0x6b   : > { %1091 = vmatmul.bf16.gmra.mxu1 %v1791_v1  ;;  %v2180_v1 = vld [vmem:[%s2743_s27 + $0x10c] sm:$0xf0] }
  0x6c   : > { %1180 = vmatmul.bf16.gmra.mxu2 %v1795_v2  ;;  %v2178_v2 = vld [vmem:[%s2743_s27 + $0x104] sm:$0xf]  ;;  %v1883_v8 = vor.u32 %v2180_v1, %v1882_v0  ;;  %v1919_v0 = vor.u32 %v2186_v54, %v1916_v55  ;;  %v1956_v54 = vld [vmem:[%s2743_s27 + $0x198] sm:$0xf0] }
  0x6d   : > { %1269 = vmatmul.bf16.gmra.mxu3 %v1799_v3  ;;  %v1884_v3 = vld [vmem:[%s2743_s27 + $0x110] sm:$0xf0] }
  0x6e   : > { %v1887_v9 = vor.u32 %v2178_v2, %v1884_v3 }
  0x7a   : > { %1007 = vmatmul.bf16.gmra.mxu0 %v1803_v12  ;;  %v1891_v12 = vor.u32 %v2181_v5, %v1890_v4  ;;  %v1923_v4 = vor.u32 %v2189_v57, %v1922_v56  ;;  %v1927_v5 = vor.u32 %v2187_v58, %v1924_v59 }
  0x7b   : > { %1096 = vmatmul.bf16.gmra.mxu1 %v1807_v13  ;;  %v1895_v13 = vor.u32 %v2179_v6, %v1892_v7 }
  0x7c   : > { %1185 = vmatmul.bf16.gmra.mxu2 %v1811_v14 }
  0x7d   : > { %1274 = vmatmul.bf16.gmra.mxu3 %v1815_v15 }
  0x8a   : > { %1012 = vmatmul.bf16.gmra.mxu0 %v1819_v24 }
  0x8b   : > { %1101 = vmatmul.bf16.gmra.mxu1 %v1823_v25  ;;  %v2182_v25 = vld [vmem:[%s2743_s27 + $0x124] sm:$0xf] }
  0x8c   : > { %1190 = vmatmul.bf16.gmra.mxu2 %v1827_v26  ;;  %v1900_v26 = vld [vmem:[%s2743_s27 + $0x130] sm:$0xf0] }
  0x8d   : > { %1279 = vmatmul.bf16.gmra.mxu3 %v1831_v27  ;;  %v1906_v27 = vld [vmem:[%s2743_s27 + $0x128] sm:$0xf]  ;;  %v1903_v35 = vor.u32 %v2182_v25, %v1900_v26  ;;  %v1940_v25 = vld [vmem:[%s2743_s27 + $0x178] sm:$0xf0] }
  0x9a   : > { %1017 = vmatmul.bf16.gmra.mxu0 %v1835_v36 }
  0x9b   : > { %1106 = vmatmul.bf16.gmra.mxu1 %v1839_v37 }
  0x9c   : > { %1195 = vmatmul.bf16.gmra.mxu2 %v1843_v38 }
  0x9d   : > { %1284 = vmatmul.bf16.gmra.mxu3 %v1847_v39  ;;  %v1907_v39 = vor.u32 %v2185_v28, %v1906_v27 }
  0xaa   : > { %1022 = vmatmul.bf16.gmra.mxu0 %v1851_v48 }
  0xab   : > { %1111 = vmatmul.bf16.gmra.mxu1 %v1855_v49 }
  0xac   : > { %1200 = vmatmul.bf16.gmra.mxu2 %v1859_v50 }
  0xad   : > { %1289 = vmatmul.bf16.gmra.mxu3 %v1863_v51  ;;  %v1914_v51 = vld [vmem:[%s2743_s27 + $0x140] sm:$0xf] }
  0xba   : > { %1027 = vmatmul.bf16.gmra.mxu0 %v1867_v60 }
  0xbb   : > { %1116 = vmatmul.bf16.gmra.mxu1 %v1871_v61 }
  0xbc   : > { %1205 = vmatmul.bf16.gmra.mxu2 %v1875_v62 }
  0xbd   : > { %1294 = vmatmul.bf16.gmra.mxu3 %v1879_v63  ;;  %v1915_v63 = vor.u32 %v2188_v52, %v1914_v51  ;;  %v1954_v51 = vld [vmem:[%s2743_s27 + $0x188] sm:$0xf]  ;;  %v2197_v52 = vld [vmem:[%s2743_s27 + $0x194] sm:$0xf0] }
  0xc7   : > { %v993_v10 = vpop.f32.mrf.mxu0 }
  0xc8   : > { %v1082_v11 = vpop.f32.mrf.mxu1 }
  0xc9   : > { %v1083_v14 = vadd.f32 %v1082_v11, %v993_v10 }
  0xca   : > { %1032 = vmatmul.bf16.gmra.mxu0 %v1883_v8 }
  0xcb   : > { %1121 = vmatmul.bf16.gmra.mxu1 %v1887_v9 }
  0xcc   : > { %1210 = vmatmul.bf16.gmra.mxu2 %v1891_v12 }
  0xcd   : > { %1299 = vmatmul.bf16.gmra.mxu3 %v1895_v13 }
  0xcf   : > { %v1171_v15 = vpop.f32.mrf.mxu2  ;;  %v995_v19 = vpop.f32.mrf.mxu0 }
  0xd0   : > { %v1260_v16 = vpop.f32.mrf.mxu3  ;;  %v1172_v17 = vadd.f32 %v1171_v15, %v1083_v14  ;;  %v1084_v20 = vpop.f32.mrf.mxu1 }
  0xd1   : > { %v1085_v31 = vadd.f32 %v1084_v20, %v995_v19  ;;  %v2190_v20 = vld [vmem:[%s2743_s27 + $0x164] sm:$0xf] }
  0xd2   : > { %v1261_v21 = vadd.f32 %v1260_v16, %v1172_v17  ;;  %v1930_v16 = vld [vmem:[%s2743_s27 + $0x160] sm:$0xf]  ;;  %v2192_v17 = vld [vmem:[%s2743_s27 + $0x16c] sm:$0xf0] }
  0xd3   : > { %v1931_v29 = vor.u32 %v2192_v17, %v1930_v16  ;;  %v1970_v16 = vld [vmem:[%s2743_s27 + $0x1a8] sm:$0xf]  ;;  %v2201_v17 = vld [vmem:[%s2743_s27 + $0x1b4] sm:$0xf0] }
  0xd4   : > { %v1443_v24 = vadd.f32 %v2829_v18, %v1261_v21  ;;  %v1932_v21 = vld [vmem:[%s2743_s27 + $0x170] sm:$0xf0] }
  0xd5   : > { %v1935_v30 = vor.u32 %v2190_v20, %v1932_v21  ;;  %v1972_v20 = vld [vmem:[%s2743_s27 + $0x1b8] sm:$0xf0] }
  0xd6   : > { %1475 = vst [vmem:[%s2840_s30] sm:$0xff] %v1443_v24 }
  0xd7   : > { %v1173_v32 = vpop.f32.mrf.mxu2  ;;  %v998_v37 = vpop.f32.mrf.mxu0 }
  0xd8   : > { %v1262_v33 = vpop.f32.mrf.mxu3  ;;  %v1174_v36 = vadd.f32 %v1173_v32, %v1085_v31  ;;  %v1087_v38 = vpop.f32.mrf.mxu1 }
  0xd9   : > { %v1088_v43 = vadd.f32 %v1087_v38, %v998_v37 }
  0xda   : > { %v1263_v41 = vadd.f32 %v1262_v33, %v1174_v36  ;;  %1037 = vmatmul.bf16.gmra.mxu0 %v1899_v34  ;;  %v1939_v34 = vor.u32 %v2193_v23, %v1938_v22 }
  0xdb   : > { %1126 = vmatmul.bf16.gmra.mxu1 %v1903_v35 }
  0xdc   : > { %v1444_v42 = vadd.f32 %v2829_v18, %v1263_v41  ;;  %1215 = vmatmul.bf16.gmra.mxu2 %v1907_v39 }
  0xdd   : > { %1304 = vmatmul.bf16.gmra.mxu3 %v1911_v40 }
  0xde   : > { %1476 = vst [vmem:[%s2840_s30 + $0x8] sm:$0xff] %v1444_v42  ;;  %v2247_v44 = vpack.c.bf16 %v1444_v42, %v1443_v24  ;;  %v2191_v24 = vld [vmem:[%s2743_s27 + $0x16c] sm:$0xf] }
  0xdf   : > { %v1176_v45 = vpop.f32.mrf.mxu2  ;;  %v1000_v48 = vpop.f32.mrf.mxu0  ;;  %v1943_v35 = vor.u32 %v2191_v24, %v1940_v25 }
  0xe0   : > { %v1265_v46 = vpop.f32.mrf.mxu3  ;;  %2248 = vst [vmem:[%s2846_s11] sm:$0xff] %v2247_v44   ;;  %v1177_v47 = vadd.f32 %v1176_v45, %v1088_v43  ;;  %v1089_v49 = vpop.f32.mrf.mxu1 }
  0xe1   : > { %v1090_v60 = vadd.f32 %v1089_v49, %v1000_v48  ;;  %v2194_v49 = vld [vmem:[%s2743_s27 + $0x184] sm:$0xf] }
  0xe2   : > { %v1266_v50 = vadd.f32 %v1265_v46, %v1177_v47  ;;  %v1946_v46 = vld [vmem:[%s2743_s27 + $0x180] sm:$0xf]  ;;  %v2196_v47 = vld [vmem:[%s2743_s27 + $0x18c] sm:$0xf0] }
  0xe3   : > { %v1947_v58 = vor.u32 %v2196_v47, %v1946_v46  ;;  %v1986_v46 = vld [vmem:[%s2743_s27 + $0x1c8] sm:$0xf]  ;;  %v2205_v47 = vld [vmem:[%s2743_s27 + $0x1d4] sm:$0xf0] }
  0xe4   : > { %v1445_v53 = vadd.f32 %v2829_v18, %v1266_v50  ;;  %v1948_v50 = vld [vmem:[%s2743_s27 + $0x190] sm:$0xf0] }
  0xe5   : > { %v1951_v59 = vor.u32 %v2194_v49, %v1948_v50  ;;  %v1988_v49 = vld [vmem:[%s2743_s27 + $0x1d8] sm:$0xf0] }
  0xe6   : > { %1477 = vst [vmem:[%s2840_s30 + $0x10] sm:$0xff] %v1445_v53 }
  0xe7   : > { %v1178_v61 = vpop.f32.mrf.mxu2  ;;  %v1003_v2 = vpop.f32.mrf.mxu0 }
  0xe8   : > { %v1267_v62 = vpop.f32.mrf.mxu3  ;;  %v1179_v1 = vadd.f32 %v1178_v61, %v1090_v60  ;;  %v1092_v3 = vpop.f32.mrf.mxu1 }
  0xe9   : > { %v1093_v8 = vadd.f32 %v1092_v3, %v1003_v2 }
  0xea   : > { %v1268_v6 = vadd.f32 %v1267_v62, %v1179_v1  ;;  %1042 = vmatmul.bf16.gmra.mxu0 %v1915_v63  ;;  %v1955_v63 = vor.u32 %v2197_v52, %v1954_v51 }
  0xeb   : > { %1131 = vmatmul.bf16.gmra.mxu1 %v1919_v0 }
  0xec   : > { %v1446_v7 = vadd.f32 %v2829_v18, %v1268_v6  ;;  %1220 = vmatmul.bf16.gmra.mxu2 %v1923_v4 }
  0xed   : > { %1309 = vmatmul.bf16.gmra.mxu3 %v1927_v5 }
  0xee   : > { %1478 = vst [vmem:[%s2840_s30 + $0x18] sm:$0xff] %v1446_v7  ;;  %v2252_v9 = vpack.c.bf16 %v1446_v7, %v1445_v53  ;;  %v2195_v53 = vld [vmem:[%s2743_s27 + $0x18c] sm:$0xf] }
  0xef   : > { %v1181_v10 = vpop.f32.mrf.mxu2  ;;  %v1005_v13 = vpop.f32.mrf.mxu0  ;;  %v1959_v0 = vor.u32 %v2195_v53, %v1956_v54 }
  0xf0   : > { %v1270_v11 = vpop.f32.mrf.mxu3  ;;  %2324 = vst [vmem:[%s2846_s11 + $0x8] sm:$0xff] %v2252_v9   ;;  %v1182_v12 = vadd.f32 %v1181_v10, %v1093_v8  ;;  %v1094_v14 = vpop.f32.mrf.mxu1 }
  0xf1   : > { %v1095_v26 = vadd.f32 %v1094_v14, %v1005_v13  ;;  %v2198_v14 = vld [vmem:[%s2743_s27 + $0x1a4] sm:$0xf] }
  0xf2   : > { %v1271_v15 = vadd.f32 %v1270_v11, %v1182_v12  ;;  %v1962_v11 = vld [vmem:[%s2743_s27 + $0x1a0] sm:$0xf]  ;;  %v2200_v12 = vld [vmem:[%s2743_s27 + $0x1ac] sm:$0xf0] }
  0xf3   : > { %v1963_v24 = vor.u32 %v2200_v12, %v1962_v11  ;;  %v2002_v11 = vld [vmem:[%s2743_s27 + $0x1e8] sm:$0xf]  ;;  %v2209_v12 = vld [vmem:[%s2743_s27 + $0x1f4] sm:$0xf0] }
  0xf4   : > { %v1447_v19 = vadd.f32 %v2829_v18, %v1271_v15  ;;  %v1964_v15 = vld [vmem:[%s2743_s27 + $0x1b0] sm:$0xf0] }
  0xf5   : > { %v1967_v25 = vor.u32 %v2198_v14, %v1964_v15  ;;  %v2004_v14 = vld [vmem:[%s2743_s27 + $0x1f8] sm:$0xf0] }
  0xf6   : > { %1479 = vst [vmem:[%s2840_s30 + $0x20] sm:$0xff] %v1447_v19 }
  0xf7   : > { %v1183_v27 = vpop.f32.mrf.mxu2  ;;  %v1008_v32 = vpop.f32.mrf.mxu0 }
  0xf8   : > { %v1272_v28 = vpop.f32.mrf.mxu3  ;;  %v1184_v31 = vadd.f32 %v1183_v27, %v1095_v26  ;;  %v1097_v33 = vpop.f32.mrf.mxu1 }
  0xf9   : > { %v1098_v38 = vadd.f32 %v1097_v33, %v1008_v32 }
  0xfa   : > { %v1273_v36 = vadd.f32 %v1272_v28, %v1184_v31  ;;  %1047 = vmatmul.bf16.gmra.mxu0 %v1931_v29  ;;  %v1971_v29 = vor.u32 %v2201_v17, %v1970_v16 }
  0xfb   : > { %1136 = vmatmul.bf16.gmra.mxu1 %v1935_v30 }
  0xfc   : > { %v1448_v37 = vadd.f32 %v2829_v18, %v1273_v36  ;;  %1225 = vmatmul.bf16.gmra.mxu2 %v1939_v34 }
  0xfd   : > { %1314 = vmatmul.bf16.gmra.mxu3 %v1943_v35 }
  0xfe   : > { %1480 = vst [vmem:[%s2840_s30 + $0x28] sm:$0xff] %v1448_v37  ;;  %v2257_v39 = vpack.c.bf16 %v1448_v37, %v1447_v19  ;;  %v2199_v19 = vld [vmem:[%s2743_s27 + $0x1ac] sm:$0xf] }
  0xff   : > { %v1186_v40 = vpop.f32.mrf.mxu2  ;;  %v1010_v43 = vpop.f32.mrf.mxu0  ;;  %v1975_v30 = vor.u32 %v2199_v19, %v1972_v20 }
 0x100   : > { %v1275_v41 = vpop.f32.mrf.mxu3  ;;  %2325 = vst [vmem:[%s2846_s11 + $0x10] sm:$0xff] %v2257_v39   ;;  %v1187_v42 = vadd.f32 %v1186_v40, %v1098_v38  ;;  %v1099_v44 = vpop.f32.mrf.mxu1 }
 0x101   : > { %v1100_v55 = vadd.f32 %v1099_v44, %v1010_v43  ;;  %v2202_v44 = vld [vmem:[%s2743_s27 + $0x1c4] sm:$0xf] }
 0x102   : > { %v1276_v45 = vadd.f32 %v1275_v41, %v1187_v42  ;;  %v1978_v41 = vld [vmem:[%s2743_s27 + $0x1c0] sm:$0xf]  ;;  %v2204_v42 = vld [vmem:[%s2743_s27 + $0x1cc] sm:$0xf0] }
 0x103   : > { %v1979_v53 = vor.u32 %v2204_v42, %v1978_v41 }
 0x104   : > { %v1449_v48 = vadd.f32 %v2829_v18, %v1276_v45  ;;  %v1980_v45 = vld [vmem:[%s2743_s27 + $0x1d0] sm:$0xf0] }
 0x105   : > { %v1983_v54 = vor.u32 %v2202_v44, %v1980_v45 }
 0x106   : > { %1481 = vst [vmem:[%s2840_s30 + $0x30] sm:$0xff] %v1449_v48 }
 0x107   : > { %v1188_v56 = vpop.f32.mrf.mxu2  ;;  %v1013_v61 = vpop.f32.mrf.mxu0 }
 0x108   : > { %v1277_v57 = vpop.f32.mrf.mxu3  ;;  %v1189_v60 = vadd.f32 %v1188_v56, %v1100_v55  ;;  %v1102_v62 = vpop.f32.mrf.mxu1 }
 0x109   : > { %v1103_v3 = vadd.f32 %v1102_v62, %v1013_v61 }
 0x10a   : > { %v1278_v1 = vadd.f32 %v1277_v57, %v1189_v60  ;;  %1052 = vmatmul.bf16.gmra.mxu0 %v1947_v58  ;;  %v1987_v58 = vor.u32 %v2205_v47, %v1986_v46 }
 0x10b   : > { %1141 = vmatmul.bf16.gmra.mxu1 %v1951_v59 }
 0x10c   : > { %v1450_v2 = vadd.f32 %v2829_v18, %v1278_v1  ;;  %1230 = vmatmul.bf16.gmra.mxu2 %v1955_v63 }
 0x10d   : > { %1319 = vmatmul.bf16.gmra.mxu3 %v1959_v0 }
 0x10e   : > { %1482 = vst [vmem:[%s2840_s30 + $0x38] sm:$0xff] %v1450_v2  ;;  %v2262_v4 = vpack.c.bf16 %v1450_v2, %v1449_v48  ;;  %v2203_v48 = vld [vmem:[%s2743_s27 + $0x1cc] sm:$0xf] }
 0x10f   : > { %v1191_v5 = vpop.f32.mrf.mxu2  ;;  %v1015_v8 = vpop.f32.mrf.mxu0  ;;  %v1991_v59 = vor.u32 %v2203_v48, %v1988_v49 }
 0x110   : > { %v1280_v6 = vpop.f32.mrf.mxu3  ;;  %2326 = vst [vmem:[%s2846_s11 + $0x18] sm:$0xff] %v2262_v4   ;;  %v1192_v7 = vadd.f32 %v1191_v5, %v1103_v3  ;;  %v1104_v9 = vpop.f32.mrf.mxu1 }
 0x111   : > { %v1105_v21 = vadd.f32 %v1104_v9, %v1015_v8  ;;  %v2206_v9 = vld [vmem:[%s2743_s27 + $0x1e4] sm:$0xf] }
 0x112   : > { %v1281_v10 = vadd.f32 %v1280_v6, %v1192_v7  ;;  %v1994_v6 = vld [vmem:[%s2743_s27 + $0x1e0] sm:$0xf]  ;;  %v2208_v7 = vld [vmem:[%s2743_s27 + $0x1ec] sm:$0xf0] }
 0x113   : > { %v1995_v19 = vor.u32 %v2208_v7, %v1994_v6 }
 0x114   : > { %v1451_v13 = vadd.f32 %v2829_v18, %v1281_v10  ;;  %v1996_v10 = vld [vmem:[%s2743_s27 + $0x1f0] sm:$0xf0] }
 0x115   : > { %v1999_v20 = vor.u32 %v2206_v9, %v1996_v10 }
 0x116   : > { %1483 = vst [vmem:[%s2840_s30 + $0x40] sm:$0xff] %v1451_v13 }
 0x117   : > { %v1193_v22 = vpop.f32.mrf.mxu2  ;;  %v1018_v27 = vpop.f32.mrf.mxu0 }
 0x118   : > { %v1282_v23 = vpop.f32.mrf.mxu3  ;;  %v1194_v26 = vadd.f32 %v1193_v22, %v1105_v21  ;;  %v1107_v28 = vpop.f32.mrf.mxu1 }
 0x119   : > { %v1108_v33 = vadd.f32 %v1107_v28, %v1018_v27 }
 0x11a   : > { %v1283_v31 = vadd.f32 %v1282_v23, %v1194_v26  ;;  %1057 = vmatmul.bf16.gmra.mxu0 %v1963_v24  ;;  %v2003_v24 = vor.u32 %v2209_v12, %v2002_v11 }
 0x11b   : > { %1146 = vmatmul.bf16.gmra.mxu1 %v1967_v25 }
 0x11c   : > { %v1452_v32 = vadd.f32 %v2829_v18, %v1283_v31  ;;  %1235 = vmatmul.bf16.gmra.mxu2 %v1971_v29 }
 0x11d   : > { %1324 = vmatmul.bf16.gmra.mxu3 %v1975_v30 }
 0x11e   : > { %1484 = vst [vmem:[%s2840_s30 + $0x48] sm:$0xff] %v1452_v32  ;;  %v2267_v34 = vpack.c.bf16 %v1452_v32, %v1451_v13  ;;  %v2207_v13 = vld [vmem:[%s2743_s27 + $0x1ec] sm:$0xf]  ;;  %s1608_s27 = sshll.u32 %s1605_s13, 4  ;;  %s2984_s27 = int_to_ptr.hbm [resolvable:$true] %s1608_s27 }
 0x11f   : > { %v1196_v35 = vpop.f32.mrf.mxu2  ;;  %v1020_v38 = vpop.f32.mrf.mxu0  ;;  %v2007_v25 = vor.u32 %v2207_v13, %v2004_v14 }
 0x120   : > { %v1285_v36 = vpop.f32.mrf.mxu3  ;;  %2327 = vst [vmem:[%s2846_s11 + $0x20] sm:$0xff] %v2267_v34   ;;  %v1197_v37 = vadd.f32 %v1196_v35, %v1108_v33  ;;  %v1109_v39 = vpop.f32.mrf.mxu1 }
 0x121   : > { %v1110_v50 = vadd.f32 %v1109_v39, %v1020_v38 }
 0x122   : > { %v1286_v40 = vadd.f32 %v1285_v36, %v1197_v37 }
 0x124   : > { %v1453_v43 = vadd.f32 %v2829_v18, %v1286_v40 }
 0x126   : > { %1485 = vst [vmem:[%s2840_s30 + $0x50] sm:$0xff] %v1453_v43 }
 0x127   : > { %v1198_v51 = vpop.f32.mrf.mxu2  ;;  %v1023_v56 = vpop.f32.mrf.mxu0 }
 0x128   : > { %v1287_v52 = vpop.f32.mrf.mxu3  ;;  %v1199_v55 = vadd.f32 %v1198_v51, %v1110_v50  ;;  %v1112_v57 = vpop.f32.mrf.mxu1 }
 0x129   : > { %v1113_v62 = vadd.f32 %v1112_v57, %v1023_v56 }
 0x12a   : > { %v1288_v60 = vadd.f32 %v1287_v52, %v1199_v55  ;;  %1062 = vmatmul.bf16.gmra.mxu0 %v1979_v53 }
 0x12b   : > { %1151 = vmatmul.bf16.gmra.mxu1 %v1983_v54 }
 0x12c   : > { %v1454_v61 = vadd.f32 %v2829_v18, %v1288_v60  ;;  %1240 = vmatmul.bf16.gmra.mxu2 %v1987_v58 }
 0x12d   : > { %1329 = vmatmul.bf16.gmra.mxu3 %v1991_v59 }
 0x12e   : > { %1486 = vst [vmem:[%s2840_s30 + $0x58] sm:$0xff] %v1454_v61  ;;  %v2272_v63 = vpack.c.bf16 %v1454_v61, %v1453_v43 }
 0x12f   : > { %v1201_v0 = vpop.f32.mrf.mxu2  ;;  %v1025_v3 = vpop.f32.mrf.mxu0 }
 0x130   : > { %v1290_v1 = vpop.f32.mrf.mxu3  ;;  %2328 = vst [vmem:[%s2846_s11 + $0x28] sm:$0xff] %v2272_v63   ;;  %v1202_v2 = vadd.f32 %v1201_v0, %v1113_v62  ;;  %v1114_v4 = vpop.f32.mrf.mxu1 }
 0x131   : > { %v1115_v15 = vadd.f32 %v1114_v4, %v1025_v3 }
 0x132   : > { %v1291_v5 = vadd.f32 %v1290_v1, %v1202_v2 }
 0x134   : > { %v1455_v8 = vadd.f32 %v2829_v18, %v1291_v5 }
 0x136   : > { %1487 = vst [vmem:[%s2840_s30 + $0x60] sm:$0xff] %v1455_v8 }
 0x137   : > { %v1203_v16 = vpop.f32.mrf.mxu2  ;;  %v1028_v22 = vpop.f32.mrf.mxu0 }
 0x138   : > { %v1292_v17 = vpop.f32.mrf.mxu3  ;;  %v1204_v21 = vadd.f32 %v1203_v16, %v1115_v15  ;;  %v1117_v23 = vpop.f32.mrf.mxu1 }
 0x139   : > { %v1118_v28 = vadd.f32 %v1117_v23, %v1028_v22 }
 0x13a   : > { %v1293_v26 = vadd.f32 %v1292_v17, %v1204_v21  ;;  %1067 = vmatmul.bf16.gmra.mxu0 %v1995_v19 }
 0x13b   : > { %1156 = vmatmul.bf16.gmra.mxu1 %v1999_v20 }
 0x13c   : > { %v1456_v27 = vadd.f32 %v2829_v18, %v1293_v26  ;;  %1245 = vmatmul.bf16.gmra.mxu2 %v2003_v24 }
 0x13d   : > { %1334 = vmatmul.bf16.gmra.mxu3 %v2007_v25 }
 0x13e   : > { %1488 = vst [vmem:[%s2840_s30 + $0x68] sm:$0xff] %v1456_v27  ;;  %v2277_v29 = vpack.c.bf16 %v1456_v27, %v1455_v8 }
 0x13f   : > { %v1206_v30 = vpop.f32.mrf.mxu2  ;;  %v1030_v33 = vpop.f32.mrf.mxu0 }
 0x140   : > { %v1295_v31 = vpop.f32.mrf.mxu3  ;;  %2329 = vst [vmem:[%s2846_s11 + $0x30] sm:$0xff] %v2277_v29   ;;  %v1207_v32 = vadd.f32 %v1206_v30, %v1118_v28  ;;  %v1119_v34 = vpop.f32.mrf.mxu1 }
 0x141   : > { %v1120_v37 = vadd.f32 %v1119_v34, %v1030_v33 }
 0x142   : > { %v1296_v35 = vadd.f32 %v1295_v31, %v1207_v32 }
 0x144   : > { %v1457_v36 = vadd.f32 %v2829_v18, %v1296_v35 }
 0x146   : > { %1489 = vst [vmem:[%s2840_s30 + $0x70] sm:$0xff] %v1457_v36 }
 0x147   : > { %v1208_v38 = vpop.f32.mrf.mxu2  ;;  %v1033_v41 = vpop.f32.mrf.mxu0 }
 0x148   : > { %v1297_v39 = vpop.f32.mrf.mxu3  ;;  %v1209_v40 = vadd.f32 %v1208_v38, %v1120_v37  ;;  %v1122_v42 = vpop.f32.mrf.mxu1 }
 0x149   : > { %v1123_v45 = vadd.f32 %v1122_v42, %v1033_v41 }
 0x14a   : > { %v1298_v43 = vadd.f32 %v1297_v39, %v1209_v40 }
 0x14c   : > { %v1458_v44 = vadd.f32 %v2829_v18, %v1298_v43 }
 0x14e   : > { %1490 = vst [vmem:[%s2840_s30 + $0x78] sm:$0xff] %v1458_v44  ;;  %v2282_v46 = vpack.c.bf16 %v1458_v44, %v1457_v36 }
 0x14f   : > { %v1211_v47 = vpop.f32.mrf.mxu2  ;;  %v1035_v50 = vpop.f32.mrf.mxu0 }
 0x150   : > { %v1300_v48 = vpop.f32.mrf.mxu3  ;;  %2330 = vst [vmem:[%s2846_s11 + $0x38] sm:$0xff] %v2282_v46   ;;  %v1212_v49 = vadd.f32 %v1211_v47, %v1123_v45  ;;  %v1124_v51 = vpop.f32.mrf.mxu1 }
 0x151   : > { %v1125_v54 = vadd.f32 %v1124_v51, %v1035_v50 }
 0x152   : > { %v1301_v52 = vadd.f32 %v1300_v48, %v1212_v49 }
 0x154   : > { %v1459_v53 = vadd.f32 %v2829_v18, %v1301_v52 }
 0x156   : > { %1491 = vst [vmem:[%s2840_s30 + $0x80] sm:$0xff] %v1459_v53 }
 0x157   : > { %v1213_v55 = vpop.f32.mrf.mxu2  ;;  %v1038_v58 = vpop.f32.mrf.mxu0 }
 0x158   : > { %v1302_v56 = vpop.f32.mrf.mxu3  ;;  %v1214_v57 = vadd.f32 %v1213_v55, %v1125_v54  ;;  %v1127_v59 = vpop.f32.mrf.mxu1 }
 0x159   : > { %v1128_v62 = vadd.f32 %v1127_v59, %v1038_v58 }
 0x15a   : > { %v1303_v60 = vadd.f32 %v1302_v56, %v1214_v57 }
 0x15c   : > { %v1460_v61 = vadd.f32 %v2829_v18, %v1303_v60 }
 0x15e   : > { %1492 = vst [vmem:[%s2840_s30 + $0x88] sm:$0xff] %v1460_v61  ;;  %v2287_v63 = vpack.c.bf16 %v1460_v61, %v1459_v53 }
 0x15f   : > { %v1216_v0 = vpop.f32.mrf.mxu2  ;;  %v1040_v3 = vpop.f32.mrf.mxu0 }
 0x160   : > { %v1305_v1 = vpop.f32.mrf.mxu3  ;;  %2331 = vst [vmem:[%s2846_s11 + $0x40] sm:$0xff] %v2287_v63   ;;  %v1217_v2 = vadd.f32 %v1216_v0, %v1128_v62  ;;  %v1129_v4 = vpop.f32.mrf.mxu1 }
 0x161   : > { %v1130_v7 = vadd.f32 %v1129_v4, %v1040_v3 }
 0x162   : > { %v1306_v5 = vadd.f32 %v1305_v1, %v1217_v2 }
 0x164   : > { %v1461_v6 = vadd.f32 %v2829_v18, %v1306_v5 }
 0x166   : > { %1493 = vst [vmem:[%s2840_s30 + $0x90] sm:$0xff] %v1461_v6 }
 0x167   : > { %v1218_v8 = vpop.f32.mrf.mxu2  ;;  %v1043_v11 = vpop.f32.mrf.mxu0 }
 0x168   : > { %v1307_v9 = vpop.f32.mrf.mxu3  ;;  %v1219_v10 = vadd.f32 %v1218_v8, %v1130_v7  ;;  %v1132_v12 = vpop.f32.mrf.mxu1 }
 0x169   : > { %v1133_v15 = vadd.f32 %v1132_v12, %v1043_v11 }
 0x16a   : > { %v1308_v13 = vadd.f32 %v1307_v9, %v1219_v10 }
 0x16c   : > { %v1462_v14 = vadd.f32 %v2829_v18, %v1308_v13 }
 0x16e   : > { %1494 = vst [vmem:[%s2840_s30 + $0x98] sm:$0xff] %v1462_v14  ;;  %v2292_v16 = vpack.c.bf16 %v1462_v14, %v1461_v6 }
 0x16f   : > { %v1221_v17 = vpop.f32.mrf.mxu2  ;;  %v1045_v21 = vpop.f32.mrf.mxu0 }
 0x170   : > { %v1310_v19 = vpop.f32.mrf.mxu3  ;;  %2332 = vst [vmem:[%s2846_s11 + $0x48] sm:$0xff] %v2292_v16   ;;  %v1222_v20 = vadd.f32 %v1221_v17, %v1133_v15  ;;  %v1134_v22 = vpop.f32.mrf.mxu1 }
 0x171   : > { %v1135_v25 = vadd.f32 %v1134_v22, %v1045_v21 }
 0x172   : > { %v1311_v23 = vadd.f32 %v1310_v19, %v1222_v20 }
 0x174   : > { %v1463_v24 = vadd.f32 %v2829_v18, %v1311_v23 }
 0x176   : > { %1495 = vst [vmem:[%s2840_s30 + $0xa0] sm:$0xff] %v1463_v24 }
 0x177   : > { %v1223_v26 = vpop.f32.mrf.mxu2  ;;  %v1048_v29 = vpop.f32.mrf.mxu0 }
 0x178   : > { %v1312_v27 = vpop.f32.mrf.mxu3  ;;  %v1224_v28 = vadd.f32 %v1223_v26, %v1135_v25  ;;  %v1137_v30 = vpop.f32.mrf.mxu1 }
 0x179   : > { %v1138_v33 = vadd.f32 %v1137_v30, %v1048_v29 }
 0x17a   : > { %v1313_v31 = vadd.f32 %v1312_v27, %v1224_v28 }
 0x17c   : > { %v1464_v32 = vadd.f32 %v2829_v18, %v1313_v31 }
 0x17e   : > { %1496 = vst [vmem:[%s2840_s30 + $0xa8] sm:$0xff] %v1464_v32  ;;  %v2297_v34 = vpack.c.bf16 %v1464_v32, %v1463_v24 }
 0x17f   : > { %v1226_v35 = vpop.f32.mrf.mxu2  ;;  %v1050_v38 = vpop.f32.mrf.mxu0 }
 0x180   : > { %v1315_v36 = vpop.f32.mrf.mxu3  ;;  %2333 = vst [vmem:[%s2846_s11 + $0x50] sm:$0xff] %v2297_v34   ;;  %v1227_v37 = vadd.f32 %v1226_v35, %v1138_v33  ;;  %v1139_v39 = vpop.f32.mrf.mxu1 }
 0x181   : > { %v1140_v42 = vadd.f32 %v1139_v39, %v1050_v38 }
 0x182   : > { %v1316_v40 = vadd.f32 %v1315_v36, %v1227_v37 }
 0x184   : > { %v1465_v41 = vadd.f32 %v2829_v18, %v1316_v40 }
 0x186   : > { %1497 = vst [vmem:[%s2840_s30 + $0xb0] sm:$0xff] %v1465_v41 }
 0x187   : > { %v1228_v43 = vpop.f32.mrf.mxu2  ;;  %v1053_v46 = vpop.f32.mrf.mxu0 }
 0x188   : > { %v1317_v44 = vpop.f32.mrf.mxu3  ;;  %v1229_v45 = vadd.f32 %v1228_v43, %v1140_v42  ;;  %v1142_v47 = vpop.f32.mrf.mxu1 }
 0x189   : > { %v1143_v50 = vadd.f32 %v1142_v47, %v1053_v46 }
 0x18a   : > { %v1318_v48 = vadd.f32 %v1317_v44, %v1229_v45 }
 0x18c   : > { %v1466_v49 = vadd.f32 %v2829_v18, %v1318_v48 }
 0x18e   : > { %1498 = vst [vmem:[%s2840_s30 + $0xb8] sm:$0xff] %v1466_v49  ;;  %v2302_v51 = vpack.c.bf16 %v1466_v49, %v1465_v41 }
 0x18f   : > { %v1231_v52 = vpop.f32.mrf.mxu2  ;;  %v1055_v55 = vpop.f32.mrf.mxu0 }
 0x190   : > { %v1320_v53 = vpop.f32.mrf.mxu3  ;;  %2334 = vst [vmem:[%s2846_s11 + $0x58] sm:$0xff] %v2302_v51   ;;  %v1232_v54 = vadd.f32 %v1231_v52, %v1143_v50  ;;  %v1144_v56 = vpop.f32.mrf.mxu1 }
 0x191   : > { %v1145_v59 = vadd.f32 %v1144_v56, %v1055_v55 }
 0x192   : > { %v1321_v57 = vadd.f32 %v1320_v53, %v1232_v54 }
 0x194   : > { %v1467_v58 = vadd.f32 %v2829_v18, %v1321_v57 }
 0x196   : > { %1499 = vst [vmem:[%s2840_s30 + $0xc0] sm:$0xff] %v1467_v58 }
 0x197   : > { %v1233_v60 = vpop.f32.mrf.mxu2  ;;  %v1058_v63 = vpop.f32.mrf.mxu0 }
 0x198   : > { %v1322_v61 = vpop.f32.mrf.mxu3  ;;  %v1234_v62 = vadd.f32 %v1233_v60, %v1145_v59  ;;  %v1147_v0 = vpop.f32.mrf.mxu1 }
 0x199   : > { %v1148_v3 = vadd.f32 %v1147_v0, %v1058_v63 }
 0x19a   : > { %v1323_v1 = vadd.f32 %v1322_v61, %v1234_v62 }
 0x19c   : > { %v1468_v2 = vadd.f32 %v2829_v18, %v1323_v1 }
 0x19e   : > { %1500 = vst [vmem:[%s2840_s30 + $0xc8] sm:$0xff] %v1468_v2  ;;  %v2307_v4 = vpack.c.bf16 %v1468_v2, %v1467_v58 }
 0x19f   : > { %v1236_v5 = vpop.f32.mrf.mxu2  ;;  %v1060_v8 = vpop.f32.mrf.mxu0 }
 0x1a0   : > { %v1325_v6 = vpop.f32.mrf.mxu3  ;;  %2335 = vst [vmem:[%s2846_s11 + $0x60] sm:$0xff] %v2307_v4   ;;  %v1237_v7 = vadd.f32 %v1236_v5, %v1148_v3  ;;  %v1149_v9 = vpop.f32.mrf.mxu1 }
 0x1a1   : > { %v1150_v12 = vadd.f32 %v1149_v9, %v1060_v8 }
 0x1a2   : > { %v1326_v10 = vadd.f32 %v1325_v6, %v1237_v7 }
 0x1a4   : > { %v1469_v11 = vadd.f32 %v2829_v18, %v1326_v10 }
 0x1a6   : > { %1501 = vst [vmem:[%s2840_s30 + $0xd0] sm:$0xff] %v1469_v11 }
 0x1a7   : > { %v1238_v13 = vpop.f32.mrf.mxu2  ;;  %v1063_v16 = vpop.f32.mrf.mxu0 }
 0x1a8   : > { %v1327_v14 = vpop.f32.mrf.mxu3  ;;  %v1239_v15 = vadd.f32 %v1238_v13, %v1150_v12  ;;  %v1152_v17 = vpop.f32.mrf.mxu1 }
 0x1a9   : > { %v1153_v21 = vadd.f32 %v1152_v17, %v1063_v16 }
 0x1aa   : > { %v1328_v19 = vadd.f32 %v1327_v14, %v1239_v15 }
 0x1ac   : > { %v1470_v20 = vadd.f32 %v2829_v18, %v1328_v19 }
 0x1ae   : > { %1502 = vst [vmem:[%s2840_s30 + $0xd8] sm:$0xff] %v1470_v20  ;;  %v2312_v22 = vpack.c.bf16 %v1470_v20, %v1469_v11 }
 0x1af   : > { %v1241_v23 = vpop.f32.mrf.mxu2  ;;  %v1065_v26 = vpop.f32.mrf.mxu0 }
 0x1b0   : > { %v1330_v24 = vpop.f32.mrf.mxu3  ;;  %2336 = vst [vmem:[%s2846_s11 + $0x68] sm:$0xff] %v2312_v22   ;;  %v1242_v25 = vadd.f32 %v1241_v23, %v1153_v21  ;;  %v1154_v27 = vpop.f32.mrf.mxu1 }
 0x1b1   : > { %v1155_v30 = vadd.f32 %v1154_v27, %v1065_v26 }
 0x1b2   : > { %v1331_v28 = vadd.f32 %v1330_v24, %v1242_v25 }
 0x1b4   : > { %v1471_v29 = vadd.f32 %v2829_v18, %v1331_v28 }
 0x1b6   : > { %1503 = vst [vmem:[%s2840_s30 + $0xe0] sm:$0xff] %v1471_v29 }
 0x1b7   : > { %v1243_v31 = vpop.f32.mrf.mxu2  ;;  %v1068_v34 = vpop.f32.mrf.mxu0 }
 0x1b8   : > { %v1332_v32 = vpop.f32.mrf.mxu3  ;;  %v1244_v33 = vadd.f32 %v1243_v31, %v1155_v30  ;;  %v1157_v35 = vpop.f32.mrf.mxu1 }
 0x1b9   : > { %v1158_v38 = vadd.f32 %v1157_v35, %v1068_v34 }
 0x1ba   : > { %v1333_v36 = vadd.f32 %v1332_v32, %v1244_v33 }
 0x1bc   : > { %v1472_v37 = vadd.f32 %v2829_v18, %v1333_v36 }
 0x1be   : > { %1504 = vst [vmem:[%s2840_s30 + $0xe8] sm:$0xff] %v1472_v37  ;;  %v2317_v39 = vpack.c.bf16 %v1472_v37, %v1471_v29 }
 0x1bf   : > { %v1246_v40 = vpop.f32.mrf.mxu2  ;;  %v1070_v44 = vpop.f32.mrf.mxu0 }
 0x1c0   : > { %v1335_v41 = vpop.f32.mrf.mxu3  ;;  %2337 = vst [vmem:[%s2846_s11 + $0x70] sm:$0xff] %v2317_v39   ;;  %v1247_v42 = vadd.f32 %v1246_v40, %v1158_v38  ;;  %v1159_v45 = vpop.f32.mrf.mxu1 }
 0x1c1   : > { %v1160_v47 = vadd.f32 %v1159_v45, %v1070_v44 }
 0x1c2   : > { %v1336_v43 = vadd.f32 %v1335_v41, %v1247_v42 }
 0x1c4   : > { %v1473_v46 = vadd.f32 %v2829_v18, %v1336_v43 }
 0x1c6   : > { %1505 = vst [vmem:[%s2840_s30 + $0xf0] sm:$0xff] %v1473_v46 }
 0x1c7   : > { %v1248_v48 = vpop.f32.mrf.mxu2 }
 0x1c8   : > { %v1249_v49 = vadd.f32 %v1248_v48, %v1160_v47  ;;  %v1337_v50 = vpop.f32.mrf.mxu3 }
 0x1ca   : > { %v1338_v51 = vadd.f32 %v1337_v50, %v1249_v49 }
 0x1cc   : > { %v1474_v52 = vadd.f32 %v2829_v18, %v1338_v51 }
 0x1ce   : > { %1506 = vst [vmem:[%s2840_s30 + $0xf8] sm:$0xff] %v1474_v52  ;;  %v2322_v53 = vpack.c.bf16 %v1474_v52, %v1473_v46 }
 0x1cf   : > { %2513 = shalt.err (!%p2510_p0)
}
 0x1d0   : > { %s2611_s30 = smov 128   ;;  %s2612_s6 = smov 8   ;;  %2338 = vst [vmem:[%s2846_s11 + $0x78] sm:$0xff] %v2322_v53  }
 0x1d1   : > { %2345 = dma.vmem_to_hbm [thread:$0]  (%p2719_p5), %s2978_s7, 4096, %s1592_s21, %s1572_s1, %s2611_s30, %s2611_s30, %s2612_s6  }
 0x1d2   : > { %s1577_s24 = scalar_lea.sflag [#allocation10], %s2739_s10  ;;  %s2528_s8 = sshra.s32 %s2984_s27, 4  ;;  %s2529_s8 = int_to_ptr.hbm [resolvable:$true] %s2528_s8 }
 0x1d3   : > { %s2530_s13 = scalar_lea.hbm %s2529_s8, 128  ;;  %s2534_s9 = scalar_lea.hbm %s3041_s4, 256 }
 0x1d4   : > { %p2531_p3 = scmp.ne.s32.totalorder %s2529_s8, %s2530_s13  ;;  %p2535_p2 = scmp.lt.s32.totalorder %s2529_s8, %s3041_s4 }
 0x1d5   : > { %p2536_p1 = scmp.lt.s32.totalorder %s2534_s9, %s2530_s13 }
 0x1d6   : > { %p2532_p7 = pnand %p2531_p3, %p2719_p5 }
 0x1d7   : > { %p2537_p4 = por %p2536_p1, %p2535_p2 }
 0x1d8   : > { %p2533_p9 = pneg %p2532_p7 }
 0x1da   : > { %p2538_p8 = pnand %p2537_p4, %p2533_p9 }
 0x1dc   : > { %2541 = shalt.err (!%p2538_p8)
}
 0x1dd   : > { %s2613_s10 = smov 64   ;;  %s2614_s11 = smov 4  }
 0x1de   : > { %2346 = dma.vmem_to_hbm [thread:$0]  (%p2719_p5), %s2982_s18, 2048, %s2984_s27, %s1577_s24, %s2613_s10, %s2613_s10, %s2614_s11  }
 0x1df PF: > { %s1623_s7 = sand.u32 1, %s2584_s15   ;;  %p2358_p10 = pnand %p1742_p11, %p2689_p6 }
 0x1e0   : > { %s1624_s21 = scalar_lea.sflag [#allocation5], %s1623_s7 }
 0x1e1   : > { %p2359_p12 = pneg %p2358_p10 }
 0x1e3   : > { %2575 = dma.done.wait (%p2359_p12), %s1624_s21, 4096  }
 0x1e4   : > { %2577 = vsyncadd (%p2359_p12), %s1624_s21, 4294963200  ;;  %s1634_s1 = scalar_lea.sflag [#allocation10], %s1623_s7 }
 0x1e5   : > { %2579 = dma.done.wait (%p2359_p12), %s1634_s1, 2048  }
 0x1e6   : > { %2581 = vsyncadd (%p2359_p12), %s1634_s1, 4294965248  ;;  %s25_s20 = sadd.s32 1, %s2604_s20   ;;  %s3053_s12 = sld [smem:[#allocation15_spill]] }
 0x1e7   : > { %p22_p13 = scmp.ge.s32.totalorder %s25_s20, 4   ;;  %s3054_s15 = smov %s2588_s16 }
 0x1e8   : > { %s3055_s16 = smov %s2592_s17  ;;  %s3056_s17 = smov %s2728_s22 }
 0x1e9   : > { %s3057_s18 = smov %s2600_s19  ;;  %24 = sbr.rel (!%p22_p13) target bundleno = 11 (0xb), region = 107 }
 0x1ec   : > { %s3058_s19 = smov %s3053_s12 }
 0x1ee   :  { %1640 = vsyncpa [#allocation4], 1 }
 0x1ef   :  { %1642 = vsyncpa [#allocation4 + $0x1], 1 }
 0x1f0   :  { %1643 = vsyncpa [#allocation7], 1 }
 0x1f1   :  { %1644 = vsyncpa [#allocation5], 1 }
 0x1f2   :  { %1646 = vsyncpa [#allocation5 + $0x1], 1 }
 0x1f3   :  { %1647 = vsyncpa [#allocation10], 1 }
 0x1f4   :  { %1649 = vsyncpa [#allocation10 + $0x1], 1 }

</bundles_post_ra>
